<compile_context>
chip_gen: v5e
topology: v5e:2x2
jax: 0.10.0
libtpu: 0.0.40
codegen_flags: <defaults>
</compile_context>

<pallas_src>
import jax
import jax.numpy as jnp
import numpy as np
from jax.experimental import pallas as pl
from jax.experimental.pallas import tpu as pltpu


def _round_up(x, m):
    return ((x + m - 1) // m) * m


def _pad_to(a, shape):
    pads = [(0, s - d) for d, s in zip(a.shape, shape)]
    if all(p == (0, 0) for p in pads):
        return a
    return jnp.pad(a, pads)


def _t_tile_candidates(T, U):
    """Divisors of T legal for the (t_tile, E) block and flat (t_tile*U, v) output."""
    divs = [d for d in range(1, T + 1) if T % d == 0]
    good = [d for d in divs if (d % 8 == 0 or d == T) and (d * U) % 8 == 0]
    return good if good else divs


def _default_t_tile(T, U, target_rows):
    """Smallest legal divisor of T giving a final-GEMM M dim (t_tile*U) >= target_rows."""
    cands = _t_tile_candidates(T, U)
    target = -(-target_rows // max(U, 1))  # ceil(target_rows / U)
    for d in cands:
        if d >= target:
            return d
    return cands[-1]


def _default_v_tile(V, cap=1024):
    """Multiple-of-128 vocab tile.

    Prefer a tile that divides the 128-padded vocab (so padding is only the
    128-rounding); otherwise pad Vp up to a multiple of `cap` rather than
    collapsing to tiny 128-wide tiles."""
    v128 = _round_up(V, 128)
    if v128 <= cap:
        return v128
    best = None
    d = 128
    while d <= cap:
        if v128 % d == 0:
            best = d
        d += 128
    if best is not None and best >= 512:
        return best
    return cap


def _vmem_estimate(t_tile, U, E, P, Hp, v_tile, cbytes, obytes):
    """Rough live-VMEM estimate for one grid step (double-buffered blocks + scratch)."""
    rows = t_tile * U
    est = 0
    est += 2 * t_tile * E * 4                      # enc input block
    est += 2 * U * P * 4                           # pred input block
    est += 2 * (E * Hp + P * Hp) * cbytes          # w_enc + w_pred
    est += 2 * (Hp * v_tile) * cbytes              # w_out tile
    est += 2 * (2 * Hp + v_tile) * 4               # biases
    est += 2 * rows * v_tile * obytes              # output block
    est += rows * Hp * cbytes                      # joint scratch
    est += rows * Hp * 4                           # transient f32 broadcast/tanh temp
    return est


def _jointnet_kernel(enc_ref, pred_ref,
                     w_enc_ref, b_enc_ref,
                     w_pred_ref, b_pred_ref,
                     w_out_ref, b_out_ref,
                     out_ref,
                     joint_ref):
    # enc_ref   (1, tT, E)        pred_ref   (1, U, P)
    # w_enc_ref (E, Hp)  cdt      b_enc_ref  (1, Hp)  f32
    # w_pred_ref(P, Hp)  cdt      b_pred_ref (1, Hp)  f32
    # w_out_ref (Hp, tV) cdt      b_out_ref  (1, tV)  f32
    # out_ref   (tT*U, tV)        joint_ref  (tT*U, Hp) cdt scratch
    v = pl.program_id(2)
    cdt = w_enc_ref.dtype  # MXU compute dtype (bf16 by default), f32 accumulation

    # Enc/pred projections + broadcast add + tanh: once per (b, t) tile, reused
    # across all V tiles.  The pred projection is a tiny (U,P)x(P,Hp) GEMM that
    # hides under the vocab GEMM; recomputing it here (instead of carrying it
    # across T) keeps the T grid axis carry-free so it can be marked "parallel".
    @pl.when(v == 0)
    def _():
        pred = pred_ref[0].astype(cdt)                                     # (U, P)
        h_pred = (
            jnp.dot(pred, w_pred_ref[...], preferred_element_type=jnp.float32)
            + b_pred_ref[...])                                             # (U, Hp) f32
        enc = enc_ref[0].astype(cdt)                                       # (tT, E)
        h_enc = (
            jnp.dot(enc, w_enc_ref[...], preferred_element_type=jnp.float32)
            + b_enc_ref[...])                                              # (tT, Hp) f32
        joint = jnp.tanh(h_enc[:, None, :] + h_pred[None, :, :])           # (tT, U, Hp) f32
        tt, u, hp = joint.shape
        joint_ref[...] = joint.reshape(tt * u, hp).astype(joint_ref.dtype)

    # Vocab projection for this V tile -> lane-dense (tT*U, tV) store.
    out_ref[...] = (
        jnp.dot(joint_ref[...], w_out_ref[...], preferred_element_type=jnp.float32)
        + b_out_ref[...]).astype(out_ref.dtype)


def jointnet_forward(enc, pred, params, *, t_tile=None, v_tile=None,
                     target_rows=512, compute_dtype=jnp.bfloat16,
                     out_dtype=None, trim_vocab=True,
                     vmem_budget_bytes=40 * 1024 * 1024,
                     vmem_limit_bytes=None):
    """enc: (B, T, E) f32; pred: (B, U, P) f32 -> (B, T, U, V) `out_dtype` (default f32).

    If trim_vocab=False and V is not a multiple of the vocab tile, the padded
    (B, T, U, Vp) tensor is returned (padded logits are exact zeros) so the
    caller can mask downstream instead of paying for a full-output slice copy.
    """
    B, T, E = enc.shape
    Bp, U, P = pred.shape
    assert B == Bp
    w_enc, b_enc, w_pred, b_pred, w_out, b_out = params
    H, V = w_enc.shape[0], w_out.shape[0]
    assert w_enc.shape == (H, E) and w_pred.shape == (H, P) and w_out.shape == (V, H)

    f32 = jnp.float32
    out_dtype = f32 if out_dtype is None else out_dtype
    Hp = _round_up(H, 128)
    cbytes = jnp.dtype(compute_dtype).itemsize
    obytes = jnp.dtype(out_dtype).itemsize

    auto_t = t_tile is None
    auto_v = v_tile is None
    if auto_t:
        t_tile = _default_t_tile(T, U, target_rows)
    if auto_v:
        v_tile = _default_v_tile(V)

    # If the auto tiles blow the VMEM budget (sized for v7x's 64 MiB part),
    # shrink v_tile first, then t_tile (through legal divisors of T).
    if auto_t or auto_v:
        t_cands = _t_tile_candidates(T, U)
        while _vmem_estimate(t_tile, U, E, P, Hp, v_tile, cbytes,
                             obytes) > vmem_budget_bytes:
            if auto_v and v_tile > 256:
                v_tile -= 128
            elif auto_t:
                smaller = [d for d in t_cands if d < t_tile]
                if not smaller:
                    break
                t_tile = smaller[-1]
            else:
                break

    # TODO(synk): pad T / mask the tail instead of asserting for ragged T.
    assert T % t_tile == 0, "T must be a multiple of t_tile"
    assert t_tile % 8 == 0 or t_tile == T
    rows = t_tile * U
    num_t = T // t_tile
    assert rows % 8 == 0 or (B * num_t) == 1, (
        "t_tile*U must be a multiple of 8 for the flat lane-dense output layout")
    assert v_tile % 128 == 0
    Vp = _round_up(V, v_tile)
    num_v = Vp // v_tile

    # PyTorch Linear stores (out, in): pre-transpose, zero-pad, cast to compute dtype.
    w_enc_t = _pad_to(jnp.asarray(w_enc, f32).T, (E, Hp)).astype(compute_dtype)
    w_pred_t = _pad_to(jnp.asarray(w_pred, f32).T, (P, Hp)).astype(compute_dtype)
    w_out_t = _pad_to(jnp.asarray(w_out, f32).T, (Hp, Vp)).astype(compute_dtype)
    b_enc2 = _pad_to(jnp.asarray(b_enc, f32).reshape(1, H), (1, Hp))
    b_pred2 = _pad_to(jnp.asarray(b_pred, f32).reshape(1, H), (1, Hp))
    b_out2 = _pad_to(jnp.asarray(b_out, f32).reshape(1, V), (1, Vp))

    if vmem_limit_bytes is None:
        est = _vmem_estimate(t_tile, U, E, P, Hp, v_tile, cbytes, obytes)
        # Raise above v5e's 16 MiB scoped default; keep within v7x's 64 MiB physical.
        vmem_limit_bytes = int(min(64 * 1024 * 1024,
                                   max(32 * 1024 * 1024, 2 * est + (4 << 20))))

    grid = (B, num_t, num_v)

    out_flat = pl.pallas_call(
        _jointnet_kernel,
        out_shape=jax.ShapeDtypeStruct((B * T * U, Vp), out_dtype),
        grid_spec=pltpu.PrefetchScalarGridSpec(
            num_scalar_prefetch=0,
            grid=grid,
            in_specs=[
                pl.BlockSpec((1, t_tile, E), lambda b, t, v: (b, t, 0)),
                pl.BlockSpec((1, U, P),      lambda b, t, v: (b, 0, 0)),
                pl.BlockSpec((E, Hp),        lambda b, t, v: (0, 0)),
                pl.BlockSpec((1, Hp),        lambda b, t, v: (0, 0)),
                pl.BlockSpec((P, Hp),        lambda b, t, v: (0, 0)),
                pl.BlockSpec((1, Hp),        lambda b, t, v: (0, 0)),
                pl.BlockSpec((Hp, v_tile),   lambda b, t, v: (0, v)),
                pl.BlockSpec((1, v_tile),    lambda b, t, v: (0, v)),
            ],
            out_specs=pl.BlockSpec(
                (rows, v_tile), lambda b, t, v: (b * num_t + t, v)),
            scratch_shapes=[
                pltpu.VMEM((rows, Hp), compute_dtype),  # tanh joint (per (b, t) tile)
            ],
        ),
        compiler_params=pltpu.CompilerParams(
            # B and T are both independent (the joint scratch only carries along
            # the innermost V axis) -> shard both across TensorCores (v7x).
            dimension_semantics=("parallel", "parallel", "arbitrary"),
            vmem_limit_bytes=vmem_limit_bytes),
    )(enc, pred, w_enc_t, b_enc2, w_pred_t, b_pred2, w_out_t, b_out2)

    out = out_flat.reshape(B, T, U, Vp)
    if trim_vocab and Vp != V:
        # TODO(synk): fuse the consumer (log-softmax / RNN-T loss) into the kernel
        # instead of materializing this slice (it re-copies the whole logits tensor).
        out = out[..., :V]
    return out


def init_params(key, enc_hidden, pred_hidden, hidden, vocab):
    """Deterministic PyTorch-Linear-style init: U(-1/sqrt(fan_in), 1/sqrt(fan_in))."""
    ks = jax.random.split(key, 6)

    def lin(kw, kb, out_f, in_f):
        bound = 1.0 / np.sqrt(in_f)
        w = jax.random.uniform(kw, (out_f, in_f), jnp.float32, -bound, bound)
        b = jax.random.uniform(kb, (out_f,), jnp.float32, -bound, bound)
        return w, b

    w_enc, b_enc = lin(ks[0], ks[1], hidden, enc_hidden)
    w_pred, b_pred = lin(ks[2], ks[3], hidden, pred_hidden)
    w_out, b_out = lin(ks[4], ks[5], vocab, hidden)
    return (w_enc, b_enc, w_pred, b_pred, w_out, b_out)


def jointnet_reference(enc, pred, params):
    w_enc, b_enc, w_pred, b_pred, w_out, b_out = params
    he = enc @ w_enc.T + b_enc                                 # (B, T, H)
    hp = pred @ w_pred.T + b_pred                              # (B, U, H)
    joint = jnp.tanh(he[:, :, None, :] + hp[:, None, :, :])    # (B, T, U, H)
    return joint @ w_out.T + b_out                             # (B, T, U, V)


if __name__ == "__main__":
    # Small shapes; H and V deliberately NOT multiples of 128 to exercise padding.
    B, T, U = 2, 32, 8
    ENC_H, PRED_H, HID, VOCAB = 16, 16, 32, 192

    key = jax.random.PRNGKey(0)
    k_enc, k_pred, k_param = jax.random.split(key, 3)

    enc = jax.random.normal(k_enc, (B, T, ENC_H), jnp.float32)
    pred = jax.random.normal(k_pred, (B, U, PRED_H), jnp.float32)
    params = init_params(k_param, ENC_H, PRED_H, HID, VOCAB)

    ref = jax.block_until_ready(jointnet_reference(enc, pred, params))

    # 1) f32 compute path with small explicit tiles: exercises H/V padding and the
    #    joint-scratch carry across V tiles (num_v=2); tight tolerance.
    out_f32 = jax.block_until_ready(
        jointnet_forward(enc, pred, params, t_tile=8, v_tile=128,
                         compute_dtype=jnp.float32))
    assert out_f32.shape == (B, T, U, VOCAB)
    np.testing.assert_allclose(np.asarray(out_f32), np.asarray(ref),
                               rtol=1e-4, atol=1e-4)

    # 2) Default fast path: bf16 MXU operands (f32 accumulation), auto tiles
    #    (rows targeted at ~512, vocab tile = 128-padded V), f32 logits.
    out_bf16 = jax.block_until_ready(jointnet_forward(enc, pred, params))
    assert out_bf16.shape == (B, T, U, VOCAB)
    np.testing.assert_allclose(np.asarray(out_bf16), np.asarray(ref),
                               rtol=6e-2, atol=6e-2)

    # 3) bf16-logits path (halves the dominant output HBM stream); looser tolerance.
    out_b16o = jax.block_until_ready(
        jointnet_forward(enc, pred, params, out_dtype=jnp.bfloat16))
    assert out_b16o.shape == (B, T, U, VOCAB) and out_b16o.dtype == jnp.bfloat16
    np.testing.assert_allclose(np.asarray(out_b16o.astype(jnp.float32)),
                               np.asarray(ref), rtol=8e-2, atol=8e-2)

    print("KERNEL_OK")
</pallas_src>

<mosaic_0001>
module attributes {stable_mosaic.version = 11 : i64} {
  func.func @_jointnet_kernel(%arg0: i32, %arg1: i32, %arg2: i32, %arg3: memref<1x8x16xf32, #tpu.memory_space<vmem>>, %arg4: memref<1x8x16xf32, #tpu.memory_space<vmem>>, %arg5: memref<16x128xf32, #tpu.memory_space<vmem>>, %arg6: memref<1x128xf32, #tpu.memory_space<vmem>>, %arg7: memref<16x128xf32, #tpu.memory_space<vmem>>, %arg8: memref<1x128xf32, #tpu.memory_space<vmem>>, %arg9: memref<128x128xf32, #tpu.memory_space<vmem>>, %arg10: memref<1x128xf32, #tpu.memory_space<vmem>>, %arg11: memref<64x128xf32, #tpu.memory_space<vmem>>, %arg12: memref<64x128xf32, #tpu.memory_space<vmem>>) attributes {dimension_semantics = [#tpu.dimension_semantics<parallel>, #tpu.dimension_semantics<parallel>, #tpu.dimension_semantics<arbitrary>], iteration_bounds = array<i64: 2, 4, 2>, scalar_prefetch = 0 : i64, scratch_operands = 1 : i64, tpu.core_type = #tpu.core_type<tc>, window_params = [{transform_indices = @transform_0, window_bounds = array<i64: 1, 8, 16>}, {transform_indices = @transform_1, window_bounds = array<i64: 1, 8, 16>}, {pipeline_mode = #tpu.pipeline_mode<synchronous>, transform_indices = @transform_2, window_bounds = array<i64: 16, 128>}, {pipeline_mode = #tpu.pipeline_mode<synchronous>, transform_indices = @transform_3, window_bounds = array<i64: 1, 128>}, {pipeline_mode = #tpu.pipeline_mode<synchronous>, transform_indices = @transform_4, window_bounds = array<i64: 16, 128>}, {pipeline_mode = #tpu.pipeline_mode<synchronous>, transform_indices = @transform_5, window_bounds = array<i64: 1, 128>}, {transform_indices = @transform_6, window_bounds = array<i64: 128, 128>}, {transform_indices = @transform_7, window_bounds = array<i64: 1, 128>}, {transform_indices = @transform_8, window_bounds = array<i64: 64, 128>}]} {
    %c0_i32 = arith.constant 0 : i32
    %0 = arith.cmpi eq, %arg2, %c0_i32 : i32
    %1 = arith.extui %0 : i1 to i32
    %c0_i32_0 = arith.constant 0 : i32
    %2 = arith.cmpi ne, %1, %c0_i32_0 : i32
    scf.if %2 {
      %c0_8 = arith.constant 0 : index
      %c0_9 = arith.constant 0 : index
      %c0_10 = arith.constant 0 : index
      %10 = vector.load %arg4[%c0_8, %c0_9, %c0_10] : memref<1x8x16xf32, #tpu.memory_space<vmem>>, vector<1x8x16xf32>
      %11 = vector.shape_cast %10 : vector<1x8x16xf32> to vector<8x16xf32>
      %c0_11 = arith.constant 0 : index
      %c0_12 = arith.constant 0 : index
      %12 = vector.load %arg7[%c0_11, %c0_12] : memref<16x128xf32, #tpu.memory_space<vmem>>, vector<16x128xf32>
      %cst_13 = arith.constant dense<0.000000e+00> : vector<8x128xf32>
      %13 = tpu.matmul %11, %12, %cst_13 {dimension_numbers = #tpu.dot_dimension_numbers<[1], [0], [0], [1], [0, 0, 1, 1], [], []>} : vector<8x16xf32>, vector<16x128xf32>, vector<8x128xf32> -> vector<8x128xf32>
      %c0_14 = arith.constant 0 : index
      %c0_15 = arith.constant 0 : index
      %14 = vector.load %arg8[%c0_14, %c0_15] : memref<1x128xf32, #tpu.memory_space<vmem>>, vector<1x128xf32>
      %15 = vector.broadcast %14 : vector<1x128xf32> to vector<8x128xf32>
      %16 = arith.addf %13, %15 : vector<8x128xf32>
      %c0_16 = arith.constant 0 : index
      %c0_17 = arith.constant 0 : index
      %c0_18 = arith.constant 0 : index
      %17 = vector.load %arg3[%c0_16, %c0_17, %c0_18] : memref<1x8x16xf32, #tpu.memory_space<vmem>>, vector<1x8x16xf32>
      %18 = vector.shape_cast %17 : vector<1x8x16xf32> to vector<8x16xf32>
      %c0_19 = arith.constant 0 : index
      %c0_20 = arith.constant 0 : index
      %19 = vector.load %arg5[%c0_19, %c0_20] : memref<16x128xf32, #tpu.memory_space<vmem>>, vector<16x128xf32>
      %cst_21 = arith.constant dense<0.000000e+00> : vector<8x128xf32>
      %20 = tpu.matmul %18, %19, %cst_21 {dimension_numbers = #tpu.dot_dimension_numbers<[1], [0], [0], [1], [0, 0, 1, 1], [], []>} : vector<8x16xf32>, vector<16x128xf32>, vector<8x128xf32> -> vector<8x128xf32>
      %c0_22 = arith.constant 0 : index
      %c0_23 = arith.constant 0 : index
      %21 = vector.load %arg6[%c0_22, %c0_23] : memref<1x128xf32, #tpu.memory_space<vmem>>, vector<1x128xf32>
      %22 = vector.broadcast %21 : vector<1x128xf32> to vector<8x128xf32>
      %23 = arith.addf %20, %22 : vector<8x128xf32>
      %24 = vector.shape_cast %23 : vector<8x128xf32> to vector<8x1x128xf32>
      %25 = vector.shape_cast %16 : vector<8x128xf32> to vector<1x8x128xf32>
      %26 = vector.broadcast %24 : vector<8x1x128xf32> to vector<8x8x128xf32>
      %27 = vector.broadcast %25 : vector<1x8x128xf32> to vector<8x8x128xf32>
      %28 = arith.addf %26, %27 : vector<8x8x128xf32>
      %29 = math.tanh %28 : vector<8x8x128xf32>
      %30 = vector.shape_cast %29 : vector<8x8x128xf32> to vector<64x128xf32>
      %c0_24 = arith.constant 0 : index
      %c0_25 = arith.constant 0 : index
      %31 = vector.load %arg12[%c0_24, %c0_25] : memref<64x128xf32, #tpu.memory_space<vmem>>, vector<64x128xf32>
      tpu.vector_store %arg12[%c0_24, %c0_25], %30 {strides = array<i32>} : memref<64x128xf32, #tpu.memory_space<vmem>>, vector<64x128xf32>,
    } else {
    }
    %c0 = arith.constant 0 : index
    %c0_1 = arith.constant 0 : index
    %3 = vector.load %arg12[%c0, %c0_1] : memref<64x128xf32, #tpu.memory_space<vmem>>, vector<64x128xf32>
    %c0_2 = arith.constant 0 : index
    %c0_3 = arith.constant 0 : index
    %4 = vector.load %arg9[%c0_2, %c0_3] : memref<128x128xf32, #tpu.memory_space<vmem>>, vector<128x128xf32>
    %cst = arith.constant dense<0.000000e+00> : vector<64x128xf32>
    %5 = tpu.matmul %3, %4, %cst {dimension_numbers = #tpu.dot_dimension_numbers<[1], [0], [0], [1], [0, 0, 1, 1], [], []>} : vector<64x128xf32>, vector<128x128xf32>, vector<64x128xf32> -> vector<64x128xf32>
    %c0_4 = arith.constant 0 : index
    %c0_5 = arith.constant 0 : index
    %6 = vector.load %arg10[%c0_4, %c0_5] : memref<1x128xf32, #tpu.memory_space<vmem>>, vector<1x128xf32>
    %7 = vector.broadcast %6 : vector<1x128xf32> to vector<64x128xf32>
    %8 = arith.addf %5, %7 : vector<64x128xf32>
    %c0_6 = arith.constant 0 : index
    %c0_7 = arith.constant 0 : index
    %9 = vector.load %arg11[%c0_6, %c0_7] : memref<64x128xf32, #tpu.memory_space<vmem>>, vector<64x128xf32>
    tpu.vector_store %arg11[%c0_6, %c0_7], %8 {strides = array<i32>} : memref<64x128xf32, #tpu.memory_space<vmem>>, vector<64x128xf32>,
    return
  }
  func.func @transform_0(%arg0: i32, %arg1: i32, %arg2: i32) -> (i32, i32, i32) {
    %c0_i32 = arith.constant 0 : i32
    %c0_i32_0 = arith.constant 0 : i32
    return %arg0, %arg1, %c0_i32 : i32, i32, i32
  }
  func.func @transform_1(%arg0: i32, %arg1: i32, %arg2: i32) -> (i32, i32, i32) {
    %c0_i32 = arith.constant 0 : i32
    %c0_i32_0 = arith.constant 0 : i32
    %c0_i32_1 = arith.constant 0 : i32
    return %arg0, %c0_i32, %c0_i32_0 : i32, i32, i32
  }
  func.func @transform_2(%arg0: i32, %arg1: i32, %arg2: i32) -> (i32, i32) {
    %c0_i32 = arith.constant 0 : i32
    %c0_i32_0 = arith.constant 0 : i32
    %c0_i32_1 = arith.constant 0 : i32
    return %c0_i32, %c0_i32_0 : i32, i32
  }
  func.func @transform_3(%arg0: i32, %arg1: i32, %arg2: i32) -> (i32, i32) {
    %c0_i32 = arith.constant 0 : i32
    %c0_i32_0 = arith.constant 0 : i32
    %c0_i32_1 = arith.constant 0 : i32
    return %c0_i32, %c0_i32_0 : i32, i32
  }
  func.func @transform_4(%arg0: i32, %arg1: i32, %arg2: i32) -> (i32, i32) {
    %c0_i32 = arith.constant 0 : i32
    %c0_i32_0 = arith.constant 0 : i32
    %c0_i32_1 = arith.constant 0 : i32
    return %c0_i32, %c0_i32_0 : i32, i32
  }
  func.func @transform_5(%arg0: i32, %arg1: i32, %arg2: i32) -> (i32, i32) {
    %c0_i32 = arith.constant 0 : i32
    %c0_i32_0 = arith.constant 0 : i32
    %c0_i32_1 = arith.constant 0 : i32
    return %c0_i32, %c0_i32_0 : i32, i32
  }
  func.func @transform_6(%arg0: i32, %arg1: i32, %arg2: i32) -> (i32, i32) {
    %c0_i32 = arith.constant 0 : i32
    %c0_i32_0 = arith.constant 0 : i32
    return %c0_i32, %arg2 : i32, i32
  }
  func.func @transform_7(%arg0: i32, %arg1: i32, %arg2: i32) -> (i32, i32) {
    %c0_i32 = arith.constant 0 : i32
    %c0_i32_0 = arith.constant 0 : i32
    return %c0_i32, %arg2 : i32, i32
  }
  func.func @transform_8(%arg0: i32, %arg1: i32, %arg2: i32) -> (i32, i32) {
    %c4_i32 = arith.constant 4 : i32
    %0 = arith.muli %arg0, %c4_i32 : i32
    %1 = arith.addi %0, %arg1 : i32
    %c0_i32 = arith.constant 0 : i32
    return %1, %arg2 : i32, i32
  }
}

</mosaic_0001>

<bundles_post_ra>
// kernel: tpu_custom_call.1
= control target key start
LH: loop header
LB: loop body
LE: loop exit
PB: predicated region body
PF: predicated region fallthrough
CT: control target
= control target key end

     0   :  { %s1474_s0 = inlined_call_operand.vmem [shape: f32[2,32,16], index: 0, kind: input, shape index: {}]   ;;  %s1475_s1 = inlined_call_operand.vmem [shape: f32[2,8,16], index: 1, kind: input, shape index: {}]   ;;  %s1476_s2 = inlined_call_operand.vmem [shape: f32[16,128], index: 2, kind: input, shape index: {}]   ;;  %s1477_s3 = inlined_call_operand.vmem [shape: f32[1,128], index: 3, kind: input, shape index: {}]   ;;  %s1478_s4 = inlined_call_operand.vmem [shape: f32[16,128], index: 4, kind: input, shape index: {}]   ;;  %s1479_s5 = inlined_call_operand.vmem [shape: f32[1,128], index: 5, kind: input, shape index: {}]   ;;  %s1480_s6 = inlined_call_operand.hbm [shape: f32[128,256], index: 6, kind: input, shape index: {}]   ;;  %s1481_s7 = inlined_call_operand.vmem [shape: f32[1,256], index: 7, kind: input, shape index: {}]   ;;  %s1482_s8 = inlined_call_operand.hbm [shape: f32[512,256], index: 8, kind: output, shape index: {}]  }
   0x1   :  { %1495 = sst [smem:[#allocation19_spill]] %s1476_s2 }
   0x2   :  { %1496 = sst [smem:[#allocation20_spill]] %s1477_s3 }
   0x3   :  { %1497 = sst [smem:[#allocation21_spill]] %s1478_s4 }
   0x4   :  { %1498 = sst [smem:[#allocation22_spill]] %s1479_s5 }
   0x5   :  { %1499 = sst [smem:[#allocation23_spill]] %s1480_s6 }
   0x6   :  { %1500 = sst [smem:[#allocation24_spill]] %s1482_s8 }
   0x7   :  { %13 = vsyncpa [#allocation4], 0 }
   0x8   :  { %15 = vsyncpa [#allocation4 + $0x1], 0 }
   0x9   :  { %16 = vsyncpa [#allocation5], 0 }
   0xa   :  { %18 = vsyncpa [#allocation5 + $0x1], 0  ;;  %s1195_s27 = smov 0   ;;  %s1197_s28 = smov 0  }
   0xb   :  { %s1199_s29 = smov 0   ;;  %s1201_s30 = smov 0  }
   0xc   :  { %s1203_s9 = smov 0   ;;  %s1205_s10 = smov 0  }
   0xd   :  { %s1207_s11 = smov 0   ;;  %s1209_s12 = smov 0  }
   0xe   :  { %s1211_s13 = smov 0   ;;  %s1213_s14 = smov 0  }
   0xf   :  { %s1215_s15 = smov 0   ;;  %s1217_s16 = smov 0  }
  0x10   :  { %s1219_s17 = smov 0  }
  0x11 LB: > { %1501 = sst [smem:[#allocation9_spill]] %s1110_s9  ;;  %s758_s18 = sadd.s32 4294967295, %s1142_s17   ;;  %s1142_s17 = sphi %s1219_s17, %s24_s17   ;;  %s1138_s16 = sphi %s1217_s16, %s1534_s16   ;;  %s1134_s15 = sphi %s1215_s15, %s1533_s15   ;;  %s1130_s14 = sphi %s1213_s14, %s1532_s14   ;;  %s1126_s13 = sphi %s1211_s13, %s1540_s13   ;;  %s1122_s12 = sphi %s1209_s12, %s1530_s12   ;;  %s1118_s11 = sphi %s1207_s11, %s1529_s11   ;;  %s1114_s10 = sphi %s1205_s10, %s1539_s10   ;;  %s1110_s9 = sphi %s1203_s9, %s1527_s9   ;;  %s1106_s30 = sphi %s1201_s30, %s1526_s30   ;;  %s1102_s29 = sphi %s1199_s29, %s1538_s29   ;;  %s1098_s28 = sphi %s1197_s28, %s1537_s28   ;;  %s1094_s27 = sphi %s1195_s27, %s1536_s27  }
  0x12   : > { %1502 = sst [smem:[#allocation10_spill]] %s1114_s10  ;;  %s36_s20 = sadd.s32 1, %s1130_s14 }
  0x13   : > { %1503 = sst [smem:[#allocation11_spill]] %s1130_s14  ;;  %s39_s21 = sadd.s32 1, %s1134_s15 }
  0x14   : > { %1504 = sst [smem:[#allocation12_spill]] %s1134_s15  ;;  %p37_p0 = scmp.ge.s32.totalorder %s36_s20, 2 }
  0x15   : > { %1505 = sst [smem:[#allocation13_spill]] %s1138_s16  ;;  %s43_s22 = sadd.s32 1, %s1138_s16 }
  0x16   : > { %s188_s23 = sadd.s32 1, %s1114_s10  ;;  %p195_p1 = scmp.ne.s32.totalorder %s1114_s10, %s1110_s9 }
  0x17   : > { %s1542_s20 = smov (%p37_p0, %s36_s20), 0  ;;  %s1544_s21 = smov (!%p37_p0, %s39_s21), %s1134_s15 }
  0x18   : > { %1506 = sst [smem:[#allocation14_spill]] %s1542_s20  ;;  %s185_s24 = ssub.s32 %s1130_s14, %s1542_s20 }
  0x19   : > { %p196_p2 = scmp.eq.s32.totalorder %s1142_s17, 0  ;;  %p41_p3 = scmp.ge.s32.totalorder %s1544_s21, 4 }
  0x1a   : > { %p186_p4 = scmp.eq.s32.totalorder %s185_s24, 0  ;;  %p201_p6 = scmp.ne.s32.totalorder %s1110_s9, %s1106_s30 }
  0x1b   : > { %p1274_p5 = por %p196_p2, %p195_p1  ;;  %s1546_s21 = smov (%p41_p3, %s1544_s21), 0 }
  0x1c   : > { %1508 = sst [smem:[#allocation15_spill]] %s1546_s21  ;;  %s1548_s22 = smov (!%p41_p3, %s43_s22), %s1138_s16 }
  0x1d   : > { %s1284_s26 = scalar_select %p186_p4, %s1114_s10, %s188_s23  }
  0x1e   : > { %p45_p7 = scmp.ge.s32.totalorder %s1548_s22, 2  ;;  %p202_p8 = scmp.eq.s32.totalorder %s758_s18, 0 }
  0x1f   : > { %1509 = sst [smem:[#allocation16_spill]] %s1284_s26  ;;  %s760_s19 = sshll.u32 %s1138_s16, 2 }
  0x20   : > { %s246_s20 = sadd.s32 1, %s1102_s29  ;;  %s1550_s22 = smov (%p45_p7, %s1548_s22), 0 }
  0x21   : > { %1510 = sst [smem:[#allocation17_spill]] %s1550_s22  ;;  %p1292_p9 = por %p202_p8, %p201_p6 }
  0x22   : > { %s238_s8 = sadd.s32 %s1134_s15, %s760_s19  ;;  %s761_s23 = sshll.u32 %s1550_s22, 2 }
  0x23   : > { %p256_p10 = scmp.ne.s32.totalorder %s1102_s29, %s1098_s28  ;;  %s240_s26 = sadd.s32 %s761_s23, %s1546_s21 }
  0x24   : > { %p257_p11 = scmp.eq.s32.totalorder %s758_s18, 15  ;;  %s241_s5 = ssub.s32 %s238_s8, %s240_s26 }
  0x25   : > { %p262_p12 = scmp.ne.s32.totalorder %s1098_s28, %s1094_s27  ;;  %s243_s16 = sor.u32 %s241_s5, %s185_s24 }
  0x26   : > { %p1305_p13 = por %p257_p11, %p256_p10  ;;  %p244_p0 = scmp.eq.s32.totalorder %s243_s16, 0 }
  0x27   : > { %s1513_s4 = sadd.s32 4294967294, %s1142_s17   ;;  %p843_p2 = scmp.lt.s32.totalorder %s1142_s17, 16 }
  0x28   : > { %p263_p1 = scmp.eq.s32.totalorder %s1513_s4, 15  ;;  %s313_s18 = sand.u32 1, %s1114_s10  }
  0x29   : > { %s1313_s2 = scalar_select %p244_p0, %s1102_s29, %s246_s20  }
  0x2a   : > { %p1315_p3 = por %p263_p1, %p262_p12  ;;  %s764_s8 = sshll.u32 %s313_s18, 7 }
  0x2b   : > { %1514 = sst [smem:[#allocation18_spill]] %s1313_s2  ;;  %s765_s5 = sshll.u32 %s1130_s14, 3 }
  0x2c   : > { %s1516_s6 = sld [smem:[#allocation23_spill]]  ;;  %s317_s22 = scalar_lea.vmem [#allocation3], %s764_s8 }
  0x2d   : > { %s324_s16 = sshll.u32 %s317_s22, 4  ;;  %p836_p4 = pnand %p843_p2, %p1274_p5  ;;  %s325_s16 = int_to_ptr.vmem [resolvable:$true] %s324_s16 }
  0x2e   : > { %s314_s4 = scalar_lea.sflag [#allocation4], %s313_s18  ;;  %s1144_s20 = smov 256  }
  0x2f   : > { %s1145_s15 = smov 128   ;;  %s1146_s2 = smov 8  }
  0x30   : > { %p766_p6 = scmp.ge.s32.totalorder %s1142_s17, 1  ;;  %p338_p7 = scmp.lt.s32.totalorder %s1142_s17, 17 }
  0x32   : > { %s321_s23 = scalar_lea.hbm %s1516_s6, %s765_s5  ;;  %p339_p8 = pnand %p766_p6, %p338_p7 }
  0x33   : > { %s322_s21 = sshll.u32 %s321_s23, 4  ;;  %s344_s24 = sand.u32 (!%p339_p8), 1, %s1110_s9   ;;  %s323_s21 = int_to_ptr.hbm [resolvable:$true] %s322_s21 }
  0x34   : > { %838 = dma.hbm_to_vmem [thread:$0]  (!%p836_p4), %s323_s21, 2048, %s325_s16, %s314_s4, %s1144_s20, %s1145_s15, %s1146_s2  }
  0x35   : > { %342 = sbr.rel (%p339_p8) target bundleno = 406 (0x196), region = 52  ;;  %s767_s5 = sshll.u32 (!%p339_p8), %s344_s24, 7 }
  0x36   : > { %s345_s8 = scalar_lea.sflag (!%p339_p8), [#allocation4], %s344_s24  ;;  %s1329_s22 = scalar_lea.vmem (!%p339_p8), [#allocation3], %s767_s5 }
  0x3a   : > { %1085 = dma.done.wait (%p1292_p9), %s345_s8, 2048  }
  0x3b   : > { %1087 = vsyncadd (%p1292_p9), %s345_s8, 4294965248  ;;  %s1491_s2 = sand.u32 1, %s1098_s28   ;;  %p397_p5 = scmp.lt.s32.totalorder %s1126_s13, 1 }
  0x3c   : > { %s768_s15 = sshll.u32 %s1491_s2, 6  ;;  %p399_p10 = scmp.lt.s32.totalorder %s1122_s12, 3 }
  0x3d   : > { %p409_p11 = scmp.lt.s32.totalorder %s1118_s11, 1  ;;  %s1356_s9 = scalar_lea.vmem [#allocation6], %s768_s15 }
  0x3e   : > { %s398_s21 = scalar_select %p397_p5, %s1126_s13, 1 }
  0x3f   : > { %s400_s25 = scalar_select %p399_p10, %s1122_s12, 3 }
  0x40   : > { %s769_s18 = sshll.u32 %s398_s21, 2  ;;  %s771_s26 = sshll.u32 %s398_s21, 3 }
  0x41   : > { %s402_s30 = sadd.s32 %s769_s18, %s400_s25  ;;  %s408_s4 = scalar_lea.vmem %s1475_s1, %s771_s26 }
  0x42   : > { %s770_s20 = sshll.u32 %s402_s30, 3  ;;  %p772_p9 = scmp.ne.s32.totalorder %s1118_s11, 0 }
  0x43   : > { %s404_s8 = scalar_lea.vmem %s1474_s0, %s770_s20  ;;  %s1517_s18 = sld [smem:[#allocation19_spill]] (!%p772_p9) }
  0x44   : > { %s1350_s6 = scalar_select %p409_p11, %s1118_s11, 1 }
  0x45   : > { %418 = sbr.rel (%p772_p9) target bundleno = 226 (0xe2), region = 60  ;;  %s1518_s23 = sld [smem:[#allocation21_spill]] (!%p772_p9) }
  0x46   : > { %s411_s10 = scalar_lea.vmem %s1481_s7, %s1350_s6  ;;  %s1519_s5 = sld [smem:[#allocation20_spill]] (!%p772_p9) }
  0x47   : > { %s1520_s26 = sld [smem:[#allocation22_spill]] (!%p772_p9) }
  0x4a   : > { %v452_v0 = vld [vmem:[%s1517_s18 + $0x8] sm:$0xff]  ;;  %v451_v2 = vld [vmem:[%s1517_s18] sm:$0xff]  ;;  %vm426_vm0 = vcmask 130048  }
  0x4b   : > { %v421_v1 = vld [vmem:[%s1518_s23 + $0x8] sm:$0xff]  ;;  %474 = vmatpush.msra.mxu1 %v452_v0  ;;  %v450_v3 = vld [vmem:[%s404_s8] sm:$0xff] }
  0x4c   : > { %444 = vmatpush.msra.mxu0 %v421_v1  ;;  %v420_v4 = vld [vmem:[%s1518_s23] sm:$0xff] }
  0x4d   : > { %v419_v5 = vld [vmem:[%s408_s4] sm:$0xff]  ;;  %475 = vmatpush.msra.mxu1 %v451_v2 }
  0x4e   : > { %445 = vmatpush.msra.mxu0 %v420_v4  ;;  %774 = vmatmul.msk.f32.vlgmr.msra.gmra.mxu1 %vm426_vm0, %v450_v3  ;;  %v955_v6 = vld [vmem:[%s1519_s5] ss:$0 sm:$0xff] }
  0x4f   : > { %773 = vmatmul.msk.f32.vlgmr.msra.gmra.mxu0 %vm426_vm0, %v419_v5  ;;  %v956_v7 = vld [vmem:[%s1520_s26] ss:$0 sm:$0xff] }
  0xcb   : > { %v477_v8 = vpop.f32.mrf.mxu1 }
  0xcc   : > { %v447_v9 = vpop.f32.mrf.mxu0  ;;  %v478_v10 = vadd.f32 %v955_v6, %v477_v8 }
  0xcd   : > { %v448_v11 = vadd.f32 %v956_v7, %v447_v9 }
  0xce   : > { %v481_v12 = vrot.slane %v478_v10, 1  ;;  %v482_v13 = vrot.slane %v478_v10, 2  ;;  %v483_v14 = vrot.slane %v478_v10, 3  ;;  %v484_v15 = vrot.slane %v478_v10, 4 }
  0xcf   : > { %v485_v16 = vrot.slane %v478_v10, 5  ;;  %v486_v17 = vrot.slane %v478_v10, 6  ;;  %v487_v18 = vrot.slane %v478_v10, 7  ;;  %v488_v19 = vperm.slane %v478_v10, 0 }
  0xd0   : > { %v489_v20 = vperm.slane %v481_v12, 0  ;;  %v490_v21 = vperm.slane %v482_v13, 0  ;;  %v491_v22 = vperm.slane %v483_v14, 0  ;;  %v492_v23 = vperm.slane %v484_v15, 0 }
  0xd1   : > { %v493_v24 = vperm.slane %v485_v16, 0  ;;  %v494_v25 = vperm.slane %v486_v17, 0  ;;  %v504_v26 = vadd.f32 %v488_v19, %v448_v11  ;;  %v495_v27 = vperm.slane %v487_v18, 0 }
  0xd2   : > { %v505_v28 = vadd.f32 %v489_v20, %v448_v11  ;;  %v506_v29 = vadd.f32 %v490_v21, %v448_v11  ;;  %v507_v30 = vadd.f32 %v491_v22, %v448_v11  ;;  %v508_v31 = vadd.f32 %v492_v23, %v448_v11 }
  0xd3   : > { %957 = vtanh.f32 %v504_v26  ;;  %v509_v32 = vadd.f32 %v493_v24, %v448_v11  ;;  %v510_v33 = vadd.f32 %v494_v25, %v448_v11  ;;  %v511_v34 = vadd.f32 %v495_v27, %v448_v11 }
  0xd4   : > { %959 = vtanh.f32 %v505_v28 }
  0xd5   : > { %961 = vtanh.f32 %v506_v29 }
  0xd6   : > { %963 = vtanh.f32 %v507_v30 }
  0xd7   : > { %965 = vtanh.f32 %v508_v31 }
  0xd8   : > { %967 = vtanh.f32 %v509_v32 }
  0xd9   : > { %v958_v35 = vpop.eup %957  ;;  %969 = vtanh.f32 %v510_v33 }
  0xda   : > { %v960_v36 = vpop.eup %959  ;;  %971 = vtanh.f32 %v511_v34  ;;  %520 = vst [vmem:[#allocation2 + $0x30] sm:$0xff] %v958_v35 }
  0xdb   : > { %v962_v37 = vpop.eup %961  ;;  %521 = vst [vmem:[#allocation2] sm:$0xff] %v960_v36 }
  0xdc   : > { %v964_v38 = vpop.eup %963  ;;  %522 = vst [vmem:[#allocation2 + $0x18] sm:$0xff] %v962_v37 }
  0xdd   : > { %v966_v39 = vpop.eup %965  ;;  %523 = vst [vmem:[#allocation2 + $0x10] sm:$0xff] %v964_v38 }
  0xde   : > { %v968_v40 = vpop.eup %967  ;;  %524 = vst [vmem:[#allocation2 + $0x8] sm:$0xff] %v966_v39 }
  0xdf   : > { %v970_v41 = vpop.eup %969  ;;  %525 = vst [vmem:[#allocation2 + $0x20] sm:$0xff] %v968_v40 }
  0xe0   : > { %v972_v42 = vpop.eup %971  ;;  %526 = vst [vmem:[#allocation2 + $0x28] sm:$0xff] %v970_v41 }
  0xe1   : > { %527 = vst [vmem:[#allocation2 + $0x38] sm:$0xff] %v972_v42 }
  0xe2 PF: > { %v551_v43 = vld [vmem:[%s1329_s22 + $0x78] sm:$0xff]  ;;  %v550_v44 = vld [vmem:[%s1329_s22 + $0x70] sm:$0xff]  ;;  %v549_v45 = vld [vmem:[%s1329_s22 + $0x68] sm:$0xff]  ;;  %s1523_s24 = sand.u32 1, %s1098_s28  }
  0xe3   : > { %784 = vmatpush.msra.mxu2 %v551_v43  ;;  %785 = vmatpush.msra.mxu3 %v551_v43  ;;  %v548_v46 = vld [vmem:[%s1329_s22 + $0x60] sm:$0xff]  ;;  %v547_v47 = vld [vmem:[%s1329_s22 + $0x58] sm:$0xff]  ;;  %v546_v48 = vld [vmem:[%s1329_s22 + $0x50] sm:$0xff]  ;;  %s606_s5 = scalar_lea.sflag [#allocation5], %s1523_s24 }
  0xe4   : > { %556 = vmatpush.msra.mxu0 %v551_v43  ;;  %783 = vmatpush.msra.mxu1 %v551_v43  ;;  %v545_v49 = vld [vmem:[%s1329_s22 + $0x48] sm:$0xff]  ;;  %v544_v50 = vld [vmem:[%s1329_s22 + $0x40] sm:$0xff]  ;;  %v543_v51 = vld [vmem:[%s1329_s22 + $0x38] sm:$0xff] }
  0xe5   : > { %787 = vmatpush.msra.mxu2 %v550_v44  ;;  %788 = vmatpush.msra.mxu3 %v550_v44  ;;  %v542_v52 = vld [vmem:[%s1329_s22 + $0x30] sm:$0xff]  ;;  %v541_v53 = vld [vmem:[%s1329_s22 + $0x28] sm:$0xff]  ;;  %v540_v54 = vld [vmem:[%s1329_s22 + $0x20] sm:$0xff] }
  0xe6   : > { %557 = vmatpush.msra.mxu0 %v550_v44  ;;  %786 = vmatpush.msra.mxu1 %v550_v44  ;;  %v539_v55 = vld [vmem:[%s1329_s22 + $0x18] sm:$0xff]  ;;  %v538_v56 = vld [vmem:[%s1329_s22 + $0x10] sm:$0xff]  ;;  %v537_v57 = vld [vmem:[%s1329_s22 + $0x8] sm:$0xff] }
  0xe7   : > { %790 = vmatpush.msra.mxu2 %v549_v45  ;;  %791 = vmatpush.msra.mxu3 %v549_v45  ;;  %v536_v58 = vld [vmem:[%s1329_s22] sm:$0xff]  ;;  %v532_v59 = vld [vmem:[#allocation2 + $0x8] sm:$0xff]  ;;  %v528_v61 = vld [vmem:[#allocation2 + $0x30] sm:$0xff]  ;;  %s776_s22 = sshll.u32 %s1126_s13, 2  ;;  %s1521_s13 = sld [smem:[#allocation24_spill]] }
  0xe8   : > { %558 = vmatpush.msra.mxu0 %v549_v45  ;;  %789 = vmatpush.msra.mxu1 %v549_v45  ;;  %v534_v60 = vld [vmem:[#allocation2 + $0x28] sm:$0xff]  ;;  %v530_v62 = vld [vmem:[#allocation2 + $0x18] sm:$0xff]  ;;  %v533_v63 = vld [vmem:[#allocation2 + $0x20] sm:$0xff]  ;;  %s614_s4 = sadd.s32 %s1122_s12, %s776_s22 }
  0xe9   : > { %793 = vmatpush.msra.mxu2 %v548_v46  ;;  %794 = vmatpush.msra.mxu3 %v548_v46  ;;  %v535_v0 = vld [vmem:[#allocation2 + $0x38] sm:$0xff]  ;;  %v529_v1 = vld [vmem:[#allocation2] sm:$0xff]  ;;  %v531_v2 = vld [vmem:[#allocation2 + $0x10] sm:$0xff]  ;;  %s782_s16 = sshll.u32 %s614_s4, 4 }
  0xea   : > { %559 = vmatpush.msra.mxu0 %v548_v46  ;;  %792 = vmatpush.msra.mxu1 %v548_v46  ;;  %v973_v3 = vld [vmem:[%s411_s10] ss:$0 sm:$0xff]  ;;  %s619_s20 = sadd.s32 %s1118_s11, %s782_s16  ;;  %s622_s11 = sshll.u32 %s1356_s9, 4  ;;  %s623_s11 = int_to_ptr.vmem [resolvable:$true] %s622_s11 }
  0xeb   : > { %796 = vmatpush.msra.mxu2 %v547_v47  ;;  %797 = vmatpush.msra.mxu3 %v547_v47  ;;  %s779_s12 = sshll.u32 %s619_s20, 3 }
  0xec   : > { %560 = vmatpush.msra.mxu0 %v547_v47  ;;  %795 = vmatpush.msra.mxu1 %v547_v47 }
  0xed   : > { %799 = vmatpush.msra.mxu2 %v546_v48  ;;  %800 = vmatpush.msra.mxu3 %v546_v48  ;;  %s1522_s2 = smov %s1521_s13  ;;  %s621_s14 = scalar_lea.hbm %s1521_s13, %s779_s12 }
  0xee   : > { %561 = vmatpush.msra.mxu0 %v546_v48  ;;  %798 = vmatpush.msra.mxu1 %v546_v48  ;;  %s624_s15 = sshll.u32 %s621_s14, 4  ;;  %s1024_s4 = scalar_lea.hbm %s1522_s2, 1024  ;;  %s625_s15 = int_to_ptr.hbm [resolvable:$true] %s624_s15 }
  0xef   : > { %802 = vmatpush.msra.mxu2 %v545_v49  ;;  %803 = vmatpush.msra.mxu3 %v545_v49  ;;  %s1018_s21 = sshra.s32 %s625_s15, 4  ;;  %s1019_s21 = int_to_ptr.hbm [resolvable:$true] %s1018_s21 }
  0xf0   : > { %562 = vmatpush.msra.mxu0 %v545_v49  ;;  %801 = vmatpush.msra.mxu1 %v545_v49  ;;  %s1020_s25 = scalar_lea.hbm %s1019_s21, 64  ;;  %p1025_p2 = scmp.lt.s32.totalorder %s1019_s21, %s1522_s2 }
  0xf1   : > { %805 = vmatpush.msra.mxu2 %v544_v50  ;;  %806 = vmatpush.msra.mxu3 %v544_v50  ;;  %p1021_p12 = scmp.ne.s32.totalorder %s1019_s21, %s1020_s25  ;;  %p1026_p4 = scmp.lt.s32.totalorder %s1024_s4, %s1020_s25 }
  0xf2   : > { %563 = vmatpush.msra.mxu0 %v544_v50  ;;  %804 = vmatpush.msra.mxu1 %v544_v50 }
  0xf3   : > { %808 = vmatpush.msra.mxu2 %v543_v51  ;;  %809 = vmatpush.msra.mxu3 %v543_v51  ;;  %p1022_p0 = pnand %p1021_p12, %p1305_p13  ;;  %p1027_p6 = por %p1026_p4, %p1025_p2 }
  0xf4   : > { %564 = vmatpush.msra.mxu0 %v543_v51  ;;  %807 = vmatpush.msra.mxu1 %v543_v51 }
  0xf5   : > { %811 = vmatpush.msra.mxu2 %v542_v52  ;;  %812 = vmatpush.msra.mxu3 %v542_v52  ;;  %p1023_p1 = pneg %p1022_p0 }
  0xf6   : > { %565 = vmatpush.msra.mxu0 %v542_v52  ;;  %810 = vmatpush.msra.mxu1 %v542_v52 }
  0xf7   : > { %814 = vmatpush.msra.mxu2 %v541_v53  ;;  %815 = vmatpush.msra.mxu3 %v541_v53  ;;  %p1028_p7 = pnand %p1027_p6, %p1023_p1 }
  0xf8   : > { %566 = vmatpush.msra.mxu0 %v541_v53  ;;  %813 = vmatpush.msra.mxu1 %v541_v53 }
  0xf9   : > { %817 = vmatpush.msra.mxu2 %v540_v54  ;;  %818 = vmatpush.msra.mxu3 %v540_v54 }
  0xfa   : > { %567 = vmatpush.msra.mxu0 %v540_v54  ;;  %816 = vmatpush.msra.mxu1 %v540_v54 }
  0xfb   : > { %820 = vmatpush.msra.mxu2 %v539_v55  ;;  %821 = vmatpush.msra.mxu3 %v539_v55 }
  0xfc   : > { %568 = vmatpush.msra.mxu0 %v539_v55  ;;  %819 = vmatpush.msra.mxu1 %v539_v55 }
  0xfd   : > { %823 = vmatpush.msra.mxu2 %v538_v56  ;;  %824 = vmatpush.msra.mxu3 %v538_v56 }
  0xfe   : > { %569 = vmatpush.msra.mxu0 %v538_v56  ;;  %822 = vmatpush.msra.mxu1 %v538_v56 }
  0xff   : > { %826 = vmatpush.msra.mxu2 %v537_v57  ;;  %827 = vmatpush.msra.mxu3 %v537_v57 }
 0x100   : > { %570 = vmatpush.msra.mxu0 %v537_v57  ;;  %825 = vmatpush.msra.mxu1 %v537_v57 }
 0x101   : > { %829 = vmatpush.msra.mxu2 %v536_v58  ;;  %830 = vmatpush.msra.mxu3 %v536_v58 }
 0x102   : > { %584 = vmatmul.f32.vlgmr.msra.gmra.mxu2 %v532_v59  ;;  %590 = vmatmul.f32.vlgmr.msra.gmra.mxu3 %v534_v60 }
 0x103   : > { %571 = vmatpush.msra.mxu0 %v536_v58  ;;  %828 = vmatpush.msra.mxu1 %v536_v58 }
 0x104   : > { %572 = vmatmul.f32.vlgmr.msra.gmra.mxu0 %v528_v61  ;;  %578 = vmatmul.f32.vlgmr.msra.gmra.mxu1 %v530_v62 }
 0x10a   : > { %587 = vmatmul.f32.gmra.mxu2 %v533_v63  ;;  %593 = vmatmul.f32.gmra.mxu3 %v535_v0 }
 0x10c   : > { %575 = vmatmul.f32.gmra.mxu0 %v529_v1  ;;  %581 = vmatmul.f32.gmra.mxu1 %v531_v2 }
 0x181   : > { %v573_v4 = vpop.f32.mrf.mxu0  ;;  %v579_v5 = vpop.f32.mrf.mxu1 }
 0x182   : > { %v574_v6 = vadd.f32 %v973_v3, %v573_v4  ;;  %v580_v7 = vadd.f32 %v973_v3, %v579_v5 }
 0x184   : > { %597 = vst [vmem:[%s1356_s9] sm:$0xff] %v574_v6 }
 0x185   : > { %599 = vst [vmem:[%s1356_s9 + $0x10] sm:$0xff] %v580_v7  ;;  %v585_v8 = vpop.f32.mrf.mxu2  ;;  %v591_v9 = vpop.f32.mrf.mxu3 }
 0x186   : > { %v586_v10 = vadd.f32 %v973_v3, %v585_v8  ;;  %v592_v11 = vadd.f32 %v973_v3, %v591_v9 }
 0x188   : > { %601 = vst [vmem:[%s1356_s9 + $0x20] sm:$0xff] %v586_v10 }
 0x189   : > { %603 = vst [vmem:[%s1356_s9 + $0x30] sm:$0xff] %v592_v11  ;;  %v576_v12 = vpop.f32.mrf.mxu0  ;;  %v582_v13 = vpop.f32.mrf.mxu1 }
 0x18a   : > { %v577_v14 = vadd.f32 %v973_v3, %v576_v12  ;;  %v583_v15 = vadd.f32 %v973_v3, %v582_v13 }
 0x18c   : > { %598 = vst [vmem:[%s1356_s9 + $0x8] sm:$0xff] %v577_v14 }
 0x18d   : > { %600 = vst [vmem:[%s1356_s9 + $0x18] sm:$0xff] %v583_v15  ;;  %v588_v16 = vpop.f32.mrf.mxu2  ;;  %v594_v17 = vpop.f32.mrf.mxu3 }
 0x18e   : > { %v589_v18 = vadd.f32 %v973_v3, %v588_v16  ;;  %v595_v19 = vadd.f32 %v973_v3, %v594_v17 }
 0x190   : > { %602 = vst [vmem:[%s1356_s9 + $0x28] sm:$0xff] %v589_v18 }
 0x191   : > { %604 = vst [vmem:[%s1356_s9 + $0x38] sm:$0xff] %v595_v19 }
 0x192   : > { %1031 = shalt.err (!%p1028_p7)
}
 0x193   : > { %s1147_s9 = smov 128   ;;  %s1148_s16 = smov 256  }
 0x194   : > { %s1149_s20 = smov 8  }
 0x195   : > { %833 = dma.vmem_to_hbm [thread:$0]  (%p1305_p13), %s623_s11, 1024, %s625_s15, %s606_s5, %s1147_s9, %s1148_s16, %s1149_s20  }
 0x196 PF: > { %p844_p8 = scmp.ge.s32.totalorder %s1142_s17, 2  ;;  %s639_s12 = sand.u32 1, %s1094_s27  }
 0x197   : > { %s640_s6 = scalar_lea.sflag [#allocation5], %s639_s12 }
 0x198   : > { %p840_p5 = pnand %p844_p8, %p1315_p3 }
 0x19a   : > { %p841_p10 = pneg %p840_p5 }
 0x19c   : > { %1089 = dma.done.wait (%p841_p10), %s640_s6, 1024  }
 0x19d   : > { %1091 = vsyncadd (%p841_p10), %s640_s6, 4294966272  ;;  %s24_s17 = sadd.s32 1, %s1142_s17   ;;  %s1525_s3 = sld [smem:[#allocation18_spill]] }
 0x19e   : > { %p1430_p11 = scmp.ge.s32.totalorder %s24_s17, 18   ;;  %s1526_s30 = sld [smem:[#allocation9_spill]] }
 0x19f   : > { %s1527_s9 = sld [smem:[#allocation10_spill]]  ;;  %s1536_s27 = smov %s1098_s28 }
 0x1a0   : > { %s1528_s13 = sld [smem:[#allocation16_spill]]  ;;  %s1537_s28 = smov %s1102_s29 }
 0x1a1   : > { %s1529_s11 = sld [smem:[#allocation11_spill]] }
 0x1a2   : > { %s1530_s12 = sld [smem:[#allocation12_spill]] }
 0x1a3   : > { %s1531_s19 = sld [smem:[#allocation13_spill]]  ;;  %s1538_s29 = smov %s1525_s3 }
 0x1a4   : > { %s1532_s14 = sld [smem:[#allocation14_spill]] }
 0x1a5   : > { %s1533_s15 = sld [smem:[#allocation15_spill]]  ;;  %23 = sbr.rel (!%p1430_p11) target bundleno = 17 (0x11), region = 110 }
 0x1a6   : > { %s1534_s16 = sld [smem:[#allocation17_spill]]  ;;  %s1539_s10 = smov %s1528_s13 }
 0x1a9   : > { %s1540_s13 = smov %s1531_s19 }
 0x1aa   :  { %646 = vsyncpa [#allocation4], 1 }
 0x1ab   :  { %648 = vsyncpa [#allocation4 + $0x1], 1 }
 0x1ac   :  { %649 = vsyncpa [#allocation5], 1 }
 0x1ad   :  { %651 = vsyncpa [#allocation5 + $0x1], 1 }

</bundles_post_ra>
